<compile_context>
chip_gen: v5e
topology: v5e:2x2
jax: 0.10.0
libtpu: 0.0.40
codegen_flags: <defaults>
</compile_context>

<pallas_src>
import functools

import jax
import jax.numpy as jnp
from jax.experimental import pallas as pl
from jax.experimental.pallas import tpu as pltpu

_LANE = 128
_SUBLANE = 8


def _round_up(a, m):
    return ((a + m - 1) // m) * m


def _vmem_limit_bytes():
    # Generation-aware scoped-VMEM limit: ~3/4 of physical capacity, capped at
    # 100 MiB (v5e/v6e have 128 MiB physical, v7x has 64 MiB per TensorCore).
    try:
        cap = int(pltpu.get_tpu_info().vmem_capacity_bytes)
    except Exception:
        cap = 64 * 1024 * 1024
    return max(32 * 1024 * 1024, min(100 * 1024 * 1024, (cap * 3) // 4))


def _conv_ln_relu_kernel(x_ref, w_ref, p_ref, o_ref, *, tT, K, C_in, C_out, eps):
    # x_ref: (1, T_in, C_in)   conv-padded input, resident across the t axis
    # w_ref: (K*C_in, C_pad)   im2col-folded conv weight (zero-padded lanes)
    # p_ref: (3, C_pad) f32    rows: conv bias, LN gamma, LN beta (zero pads)
    # o_ref: (1, C_rows, tT)   output tile, TIME on the lane axis
    t0 = pl.multiple_of(pl.program_id(1) * tT, _SUBLANE)

    if K * C_in <= _LANE:
        # Tiny C_in: single im2col matmul (the concat is only a few lanes wide).
        taps = [x_ref[0, pl.ds(t0 + k, tT), :] for k in range(K)]
        x_win = taps[0] if K == 1 else jnp.concatenate(taps, axis=-1)
        acc = jnp.dot(x_win, w_ref[...], preferred_element_type=jnp.float32)
    else:
        # Larger C_in: K accumulating matmuls, no im2col copy / lane relayout.
        acc = jnp.dot(x_ref[0, pl.ds(t0, tT), :], w_ref[:C_in, :],
                      preferred_element_type=jnp.float32)
        for k in range(1, K):
            acc += jnp.dot(x_ref[0, pl.ds(t0 + k, tT), :],
                           w_ref[k * C_in:(k + 1) * C_in, :],
                           preferred_element_type=jnp.float32)

    params = p_ref[...]                            # (3, C_pad) f32
    acc = acc + params[0:1, :]                     # conv bias -> (tT, C_pad) f32

    # LayerNorm over the real channels, no lane mask: padded lanes of `acc` are
    # exact zeros (weight & bias pads are zero), so their contribution to
    # sum((acc - mean)^2) is exactly (C_pad - C_out) * mean^2 and can be
    # removed with a scalar-per-row correction instead of jnp.where selects.
    C_pad = acc.shape[-1]
    inv_c = 1.0 / C_out
    mean = jnp.sum(acc, axis=-1, keepdims=True) * inv_c
    d = acc - mean
    var = (jnp.sum(d * d, axis=-1, keepdims=True)
           - (C_pad - C_out) * (mean * mean)) * inv_c
    y = d * jax.lax.rsqrt(var + eps)
    y = jnp.maximum(y * params[1:2, :] + params[2:3, :], 0.0)   # ReLU

    # Transpose so the store is lane-dense over time instead of 128-padded
    # channels; padded channel rows are exact zeros (gamma/beta pads are zero
    # and ReLU(0) == 0), the wrapper slices them off.
    yt = jnp.transpose(y)                          # (C_pad, tT), XLU
    o_ref[0] = yt[:o_ref.shape[1], :].astype(o_ref.dtype)


def conv_norm_relu(x, weight, bias, gamma, beta, *, kernel_size, eps=1e-5,
                   time_tile=None):
    """
    x:      [B, C_in, T]         (PyTorch NCT layout)
    weight: [C_out, C_in, K]     (PyTorch Conv1d weight layout)
    bias:   [C_out]
    gamma:  [C_out]              LayerNorm weight
    beta:   [C_out]              LayerNorm bias
    returns [B, C_out, L] with L = T + 2*(K//2) - K + 1 (== T for odd K,
            T + 1 for even K, matching nn.Conv1d(padding=K//2)).
    """
    B, C_in, T = x.shape
    C_out = weight.shape[0]
    K = kernel_size
    pad = K // 2
    L = T + 2 * pad - (K - 1)                      # conv output length (stride 1)

    # ---- tiling choices ------------------------------------------------------
    C_pad = _round_up(C_out, _LANE)                # matmul N / LayerNorm lane width
    C_rows = _round_up(C_out, _SUBLANE)            # stored channel rows (sublanes)
    L8 = _round_up(L, _SUBLANE)
    if time_tile is None:
        tT = min(512, L8)
        # If the batch axis alone can't feed both v7x TensorCores, split time.
        if B == 1 and L8 > 2 * _LANE:
            tT = min(tT, _round_up((L8 + 1) // 2, _LANE))
    else:
        tT = time_tile
    if tT >= L8:
        tT = L8                                    # single time tile
    else:
        assert tT % _LANE == 0, "time_tile must be a multiple of 128 (or >= padded L)"
    L_pad = _round_up(L, tT)
    nT = L_pad // tT
    T_in = L_pad + K - 1                           # rows the last tile may touch

    # ---- wrapper-side glue (relayout, halo pad, weight folding, precasts) ----
    x_ntc = jnp.transpose(x, (0, 2, 1))                                # [B, T, C_in]
    x_in = jnp.pad(x_ntc, ((0, 0), (pad, T_in - pad - T), (0, 0)))     # [B, T_in, C_in]

    w2d = jnp.transpose(weight, (2, 1, 0)).reshape(K * C_in, C_out)    # [K*C_in, C_out]
    w2d = jnp.pad(w2d, ((0, 0), (0, C_pad - C_out))).astype(x.dtype)   # zero-padded lanes
    params = jnp.stack([                                               # (3, C_pad) f32
        jnp.pad(bias.astype(jnp.float32), (0, C_pad - C_out)),
        jnp.pad(gamma.astype(jnp.float32), (0, C_pad - C_out)),
        jnp.pad(beta.astype(jnp.float32), (0, C_pad - C_out)),
    ])

    kernel = functools.partial(_conv_ln_relu_kernel, tT=tT, K=K,
                               C_in=C_in, C_out=C_out, eps=eps)

    out = pl.pallas_call(
        kernel,
        out_shape=jax.ShapeDtypeStruct((B, C_rows, L_pad), x.dtype),
        grid_spec=pltpu.PrefetchScalarGridSpec(
            num_scalar_prefetch=0,
            grid=(B, nT),
            in_specs=[
                # Constant along the t axis -> resident in VMEM, no re-DMA per tile.
                pl.BlockSpec((1, T_in, C_in), lambda b, t: (b, 0, 0)),
                pl.BlockSpec((K * C_in, C_pad), lambda b, t: (0, 0)),
                pl.BlockSpec((3, C_pad), lambda b, t: (0, 0)),
            ],
            out_specs=pl.BlockSpec((1, C_rows, tT), lambda b, t: (b, 0, t)),
        ),
        compiler_params=pltpu.CompilerParams(
            dimension_semantics=("parallel", "parallel"),
            vmem_limit_bytes=_vmem_limit_bytes(),
        ),
    )(x_in, w2d, params)

    # Output is already [B, C_rows, L_pad] in NCT; just drop the padding.
    return out[:, :C_out, :L]


def _reference(x, weight, bias, gamma, beta, *, kernel_size, eps=1e-5):
    """Pure-JAX reference matching the PyTorch forward."""
    pad = kernel_size // 2
    y = jax.lax.conv_general_dilated(
        x, weight,
        window_strides=(1,),
        padding=[(pad, pad)],
        dimension_numbers=("NCH", "OIH", "NCH"),
    ) + bias[None, :, None]
    y = jnp.transpose(y, (0, 2, 1))                # [B, L, C_out]
    mean = jnp.mean(y, axis=-1, keepdims=True)
    var = jnp.mean((y - mean) ** 2, axis=-1, keepdims=True)
    y = (y - mean) / jnp.sqrt(var + eps)
    y = y * gamma + beta
    y = jnp.transpose(y, (0, 2, 1))                # [B, C_out, L]
    return jnp.maximum(y, 0.0)


if __name__ == "__main__":
    key = jax.random.PRNGKey(0)
    kx, kw, kb, kg, kbe = jax.random.split(key, 5)

    # 1) Small odd-K case (single time tile, im2col path).
    B, C_in, C_out, T, K = 2, 4, 8, 16, 5
    x = jax.random.normal(kx, (B, C_in, T), dtype=jnp.float32)
    weight = jax.random.normal(kw, (C_out, C_in, K), dtype=jnp.float32) * 0.1
    bias = jax.random.normal(kb, (C_out,), dtype=jnp.float32) * 0.1
    gamma = 1.0 + 0.1 * jax.random.normal(kg, (C_out,), dtype=jnp.float32)
    beta = 0.1 * jax.random.normal(kbe, (C_out,), dtype=jnp.float32)

    out = jax.block_until_ready(
        conv_norm_relu(x, weight, bias, gamma, beta, kernel_size=K))
    ref = _reference(x, weight, bias, gamma, beta, kernel_size=K)
    assert out.shape == ref.shape == (B, C_out, T)
    assert jnp.allclose(out, ref, atol=1e-3, rtol=1e-3), "mismatch vs reference (odd K)"

    # 2) Even kernel size: Conv1d(padding=K//2) yields T+1 outputs - handled exactly.
    K2 = 4
    w_even = jax.random.normal(kw, (C_out, C_in, K2), dtype=jnp.float32) * 0.1
    out_even = jax.block_until_ready(
        conv_norm_relu(x, w_even, bias, gamma, beta, kernel_size=K2))
    ref_even = _reference(x, w_even, bias, gamma, beta, kernel_size=K2)
    assert out_even.shape == ref_even.shape == (B, C_out, T + 1)
    assert jnp.allclose(out_even, ref_even, atol=1e-3, rtol=1e-3), "mismatch vs reference (even K)"

    # 3) Multi time tile + K-accumulate path (K*C_in > 128) + C_out % 8 != 0.
    B3, C_in3, C_out3, T3, K3 = 2, 48, 10, 280, 3
    x3 = jax.random.normal(kx, (B3, C_in3, T3), dtype=jnp.float32)
    w3 = jax.random.normal(kw, (C_out3, C_in3, K3), dtype=jnp.float32) * 0.05
    b3 = jax.random.normal(kb, (C_out3,), dtype=jnp.float32) * 0.1
    g3 = 1.0 + 0.1 * jax.random.normal(kg, (C_out3,), dtype=jnp.float32)
    be3 = 0.1 * jax.random.normal(kbe, (C_out3,), dtype=jnp.float32)
    out3 = jax.block_until_ready(
        conv_norm_relu(x3, w3, b3, g3, be3, kernel_size=K3, time_tile=128))
    ref3 = _reference(x3, w3, b3, g3, be3, kernel_size=K3)
    assert out3.shape == ref3.shape == (B3, C_out3, T3)
    assert jnp.allclose(out3, ref3, atol=1e-3, rtol=1e-3), "mismatch vs reference (tiled/accumulate)"

    print("KERNEL_OK")
</pallas_src>

<mosaic_0001>
module attributes {stable_mosaic.version = 11 : i64} {
  func.func @_conv_ln_relu_kernel(%arg0: i32, %arg1: i32, %arg2: memref<1x20x4xf32, #tpu.memory_space<vmem>>, %arg3: memref<20x128xf32, #tpu.memory_space<vmem>>, %arg4: memref<3x128xf32, #tpu.memory_space<vmem>>, %arg5: memref<1x8x16xf32, #tpu.memory_space<vmem>>) attributes {dimension_semantics = [#tpu.dimension_semantics<parallel>, #tpu.dimension_semantics<parallel>], iteration_bounds = array<i64: 2, 1>, scalar_prefetch = 0 : i64, scratch_operands = 0 : i64, tpu.core_type = #tpu.core_type<tc>, window_params = [{transform_indices = @transform_0, window_bounds = array<i64: 1, 20, 4>}, {pipeline_mode = #tpu.pipeline_mode<synchronous>, transform_indices = @transform_1, window_bounds = array<i64: 20, 128>}, {pipeline_mode = #tpu.pipeline_mode<synchronous>, transform_indices = @transform_2, window_bounds = array<i64: 3, 128>}, {transform_indices = @transform_3, window_bounds = array<i64: 1, 8, 16>}]} {
    %c16_i32 = arith.constant 16 : i32
    %0 = arith.muli %arg1, %c16_i32 : i32
    %1 = tpu.assume_multiple %0, 8 : i32
    %c0_i32 = arith.constant 0 : i32
    %2 = arith.addi %1, %c0_i32 : i32
    %c0 = arith.constant 0 : index
    %3 = arith.index_cast %2 : i32 to index
    %c0_0 = arith.constant 0 : index
    %4 = vector.load %arg2[%c0, %3, %c0_0] : memref<1x20x4xf32, #tpu.memory_space<vmem>>, vector<1x16x4xf32>
    %5 = vector.shape_cast %4 : vector<1x16x4xf32> to vector<16x4xf32>
    %c1_i32 = arith.constant 1 : i32
    %6 = arith.addi %1, %c1_i32 : i32
    %c0_1 = arith.constant 0 : index
    %7 = arith.index_cast %6 : i32 to index
    %c0_2 = arith.constant 0 : index
    %8 = vector.load %arg2[%c0_1, %7, %c0_2] : memref<1x20x4xf32, #tpu.memory_space<vmem>>, vector<1x16x4xf32>
    %9 = vector.shape_cast %8 : vector<1x16x4xf32> to vector<16x4xf32>
    %c2_i32 = arith.constant 2 : i32
    %10 = arith.addi %1, %c2_i32 : i32
    %c0_3 = arith.constant 0 : index
    %11 = arith.index_cast %10 : i32 to index
    %c0_4 = arith.constant 0 : index
    %12 = vector.load %arg2[%c0_3, %11, %c0_4] : memref<1x20x4xf32, #tpu.memory_space<vmem>>, vector<1x16x4xf32>
    %13 = vector.shape_cast %12 : vector<1x16x4xf32> to vector<16x4xf32>
    %c3_i32 = arith.constant 3 : i32
    %14 = arith.addi %1, %c3_i32 : i32
    %c0_5 = arith.constant 0 : index
    %15 = arith.index_cast %14 : i32 to index
    %c0_6 = arith.constant 0 : index
    %16 = vector.load %arg2[%c0_5, %15, %c0_6] : memref<1x20x4xf32, #tpu.memory_space<vmem>>, vector<1x16x4xf32>
    %17 = vector.shape_cast %16 : vector<1x16x4xf32> to vector<16x4xf32>
    %c4_i32 = arith.constant 4 : i32
    %18 = arith.addi %1, %c4_i32 : i32
    %c0_7 = arith.constant 0 : index
    %19 = arith.index_cast %18 : i32 to index
    %c0_8 = arith.constant 0 : index
    %20 = vector.load %arg2[%c0_7, %19, %c0_8] : memref<1x20x4xf32, #tpu.memory_space<vmem>>, vector<1x16x4xf32>
    %21 = vector.shape_cast %20 : vector<1x16x4xf32> to vector<16x4xf32>
    %22 = tpu.concatenate %5, %9, %13, %17, %21 in 1 : vector<16x4xf32>, vector<16x4xf32>, vector<16x4xf32>, vector<16x4xf32>, vector<16x4xf32> -> vector<16x20xf32>
    %c0_9 = arith.constant 0 : index
    %c0_10 = arith.constant 0 : index
    %23 = vector.load %arg3[%c0_9, %c0_10] : memref<20x128xf32, #tpu.memory_space<vmem>>, vector<20x128xf32>
    %cst = arith.constant dense<0.000000e+00> : vector<16x128xf32>
    %24 = tpu.matmul %22, %23, %cst {dimension_numbers = #tpu.dot_dimension_numbers<[1], [0], [0], [1], [0, 0, 1, 1], [], []>} : vector<16x20xf32>, vector<20x128xf32>, vector<16x128xf32> -> vector<16x128xf32>
    %c0_11 = arith.constant 0 : index
    %c0_12 = arith.constant 0 : index
    %25 = vector.load %arg4[%c0_11, %c0_12] : memref<3x128xf32, #tpu.memory_space<vmem>>, vector<3x128xf32>
    %26 = vector.extract_strided_slice %25 {offsets = [0, 0], sizes = [1, 128], strides = [1, 1]} : vector<3x128xf32> to vector<1x128xf32>
    %27 = vector.broadcast %26 : vector<1x128xf32> to vector<16x128xf32>
    %28 = arith.addf %24, %27 : vector<16x128xf32>
    %cst_13 = arith.constant dense<0.000000e+00> : vector<16xf32>
    %29 = vector.multi_reduction <add>, %28, %cst_13 [1] : vector<16x128xf32> to vector<16xf32>
    %30 = vector.shape_cast %29 : vector<16xf32> to vector<16x1xf32>
    %cst_14 = arith.constant 1.250000e-01 : f32
    %31 = vector.broadcast %cst_14 : f32 to vector<16x1xf32>
    %32 = arith.mulf %30, %31 : vector<16x1xf32>
    %33 = vector.broadcast %32 : vector<16x1xf32> to vector<16x128xf32>
    %34 = arith.subf %28, %33 : vector<16x128xf32>
    %35 = arith.mulf %34, %34 : vector<16x128xf32>
    %cst_15 = arith.constant dense<0.000000e+00> : vector<16xf32>
    %36 = vector.multi_reduction <add>, %35, %cst_15 [1] : vector<16x128xf32> to vector<16xf32>
    %37 = vector.shape_cast %36 : vector<16xf32> to vector<16x1xf32>
    %38 = arith.mulf %32, %32 : vector<16x1xf32>
    %cst_16 = arith.constant 1.200000e+02 : f32
    %39 = vector.broadcast %cst_16 : f32 to vector<16x1xf32>
    %40 = arith.mulf %39, %38 : vector<16x1xf32>
    %41 = arith.subf %37, %40 : vector<16x1xf32>
    %cst_17 = arith.constant 1.250000e-01 : f32
    %42 = vector.broadcast %cst_17 : f32 to vector<16x1xf32>
    %43 = arith.mulf %41, %42 : vector<16x1xf32>
    %cst_18 = arith.constant 9.99999974E-6 : f32
    %44 = vector.broadcast %cst_18 : f32 to vector<16x1xf32>
    %45 = arith.addf %43, %44 : vector<16x1xf32>
    %46 = math.rsqrt %45 : vector<16x1xf32>
    %47 = vector.broadcast %46 : vector<16x1xf32> to vector<16x128xf32>
    %48 = arith.mulf %34, %47 : vector<16x128xf32>
    %49 = vector.extract_strided_slice %25 {offsets = [1, 0], sizes = [1, 128], strides = [1, 1]} : vector<3x128xf32> to vector<1x128xf32>
    %50 = vector.broadcast %49 : vector<1x128xf32> to vector<16x128xf32>
    %51 = arith.mulf %48, %50 : vector<16x128xf32>
    %52 = vector.extract_strided_slice %25 {offsets = [2, 0], sizes = [1, 128], strides = [1, 1]} : vector<3x128xf32> to vector<1x128xf32>
    %53 = vector.broadcast %52 : vector<1x128xf32> to vector<16x128xf32>
    %54 = arith.addf %51, %53 : vector<16x128xf32>
    %cst_19 = arith.constant 0.000000e+00 : f32
    %55 = vector.broadcast %cst_19 : f32 to vector<16x128xf32>
    %56 = arith.maximumf %54, %55 : vector<16x128xf32>
    %57 = tpu.transpose %56, [1, 0] : vector<16x128xf32> -> vector<128x16xf32>
    %58 = vector.extract_strided_slice %57 {offsets = [0, 0], sizes = [8, 16], strides = [1, 1]} : vector<128x16xf32> to vector<8x16xf32>
    %c0_20 = arith.constant 0 : index
    %c0_21 = arith.constant 0 : index
    %c0_22 = arith.constant 0 : index
    %59 = vector.load %arg5[%c0_20, %c0_21, %c0_22] : memref<1x8x16xf32, #tpu.memory_space<vmem>>, vector<1x8x16xf32>
    %60 = vector.shape_cast %59 : vector<1x8x16xf32> to vector<8x16xf32>
    %61 = vector.shape_cast %58 : vector<8x16xf32> to vector<1x8x16xf32>
    tpu.vector_store %arg5[%c0_20, %c0_21, %c0_22], %61 {strides = array<i32>} : memref<1x8x16xf32, #tpu.memory_space<vmem>>, vector<1x8x16xf32>,
    return
  }
  func.func @transform_0(%arg0: i32, %arg1: i32) -> (i32, i32, i32) {
    %c0_i32 = arith.constant 0 : i32
    %c0_i32_0 = arith.constant 0 : i32
    %c0_i32_1 = arith.constant 0 : i32
    return %arg0, %c0_i32, %c0_i32_0 : i32, i32, i32
  }
  func.func @transform_1(%arg0: i32, %arg1: i32) -> (i32, i32) {
    %c0_i32 = arith.constant 0 : i32
    %c0_i32_0 = arith.constant 0 : i32
    %c0_i32_1 = arith.constant 0 : i32
    return %c0_i32, %c0_i32_0 : i32, i32
  }
  func.func @transform_2(%arg0: i32, %arg1: i32) -> (i32, i32) {
    %c0_i32 = arith.constant 0 : i32
    %c0_i32_0 = arith.constant 0 : i32
    %c0_i32_1 = arith.constant 0 : i32
    return %c0_i32, %c0_i32_0 : i32, i32
  }
  func.func @transform_3(%arg0: i32, %arg1: i32) -> (i32, i32, i32) {
    %c0_i32 = arith.constant 0 : i32
    %c0_i32_0 = arith.constant 0 : i32
    return %arg0, %c0_i32, %arg1 : i32, i32, i32
  }
}

</mosaic_0001>

<bundles_post_ra>
// kernel: tpu_custom_call.1
= control target key start
LH: loop header
LB: loop body
LE: loop exit
PB: predicated region body
PF: predicated region fallthrough
CT: control target
= control target key end

     0   :  { %8 = vsyncpa [#allocation3], 0  ;;  %s792_s0 = inlined_call_operand.vmem [shape: f32[2,20,4], index: 0, kind: input, shape index: {}]   ;;  %s793_s1 = inlined_call_operand.vmem [shape: f32[20,128], index: 1, kind: input, shape index: {}]   ;;  %s794_s2 = inlined_call_operand.vmem [shape: f32[3,128], index: 2, kind: input, shape index: {}]   ;;  %s795_s3 = inlined_call_operand.hbm [shape: f32[2,8,16], index: 3, kind: output, shape index: {}]  }
   0x1   :  { %10 = vsyncpa [#allocation3 + $0x1], 0  ;;  %s666_s12 = smov 0   ;;  %s668_s13 = smov 0  }
   0x2   :  { %s670_s14 = smov 0   ;;  %s672_s15 = smov 0  }
   0x3   :  { %s674_s16 = smov 0   ;;  %s676_s17 = smov 0  }
   0x4 LB: > { %s472_s18 = sadd.s32 4294967295, %s640_s17   ;;  %s473_s19 = sadd.s32 4294967294, %s640_s17   ;;  %s640_s17 = sphi %s676_s17, %s16_s17   ;;  %s636_s16 = sphi %s674_s16, %s802_s16   ;;  %s632_s15 = sphi %s672_s15, %s801_s15   ;;  %s628_s14 = sphi %s670_s14, %s800_s14   ;;  %s624_s13 = sphi %s668_s13, %s799_s13   ;;  %s620_s12 = sphi %s666_s12, %s798_s12  }
   0x5   : > { %s28_s20 = sadd.s32 1, %s636_s16  ;;  %s105_s21 = sadd.s32 1, %s628_s14 }
   0x6   : > { %p30_p0 = scmp.ge.s32.totalorder %s28_s20, 2  ;;  %p115_p1 = scmp.ne.s32.totalorder %s628_s14, %s624_s13 }
   0x7   : > { %p116_p2 = scmp.eq.s32.totalorder %s472_s18, 1  ;;  %p121_p3 = scmp.ne.s32.totalorder %s624_s13, %s620_s12 }
   0x8   : > { %s804_s20 = smov (%p30_p0, %s28_s20), 0  ;;  %p122_p5 = scmp.eq.s32.totalorder %s473_s19, 1 }
   0x9   : > { %p706_p4 = por %p116_p2, %p115_p1  ;;  %s100_s23 = ssub.s32 %s636_s16, %s804_s20 }
   0xa   : > { %p476_p6 = scmp.ge.s32.totalorder %s640_s17, 1  ;;  %p103_p7 = scmp.eq.s32.totalorder %s100_s23, 0 }
   0xb   : > { %p713_p8 = por %p122_p5, %p121_p3  ;;  %p154_p9 = scmp.lt.s32.totalorder %s640_s17, 3 }
   0xc   : > { %s719_s25 = scalar_select %p103_p7, %s628_s14, %s105_s21  }
   0xd   : > { %p155_p10 = pnand %p476_p6, %p154_p9 }
   0xe   : > { %p178_p11 = scmp.lt.s32.totalorder (!%p155_p10), %s632_s15, 1  ;;  %s642_s4 = smov (!%p155_p10), 4  }
   0xf   : > { %158 = sbr.rel (%p155_p10) target bundleno = 707 (0x2c3), region = 32  ;;  %s643_s5 = smov (!%p155_p10), 12  }
  0x10   : > { %s644_s6 = smov (!%p155_p10), 16   ;;  %s645_s7 = smov (!%p155_p10), 8  }
  0x11   : > { %s491_s28 = sshll.u32 (!%p155_p10), %s632_s15, 3  ;;  %s582_s18 = scalar_lea.hbm (!%p155_p10), %s795_s3, 16 }
  0x14   : > { %s179_s26 = scalar_select %p178_p11, %s632_s15, 1  ;;  %v249_v8 = vld [vmem:[%s793_s1 + $0x10] sm:$0xf]  ;;  %vm259_vm0 = vcmask 1043456   ;;  %v248_v9 = vld [vmem:[%s793_s1 + $0x8] sm:$0xff]  ;;  %v247_v10 = vld [vmem:[%s793_s1] sm:$0xff] }
  0x15   : > { %487 = vmatpush.msk.msra.mxu0 %vm259_vm0, %v249_v8  ;;  %494 = vmatpush.msk.msra.mxu1 %vm259_vm0, %v249_v8  ;;  %vm235_vm1 = vcmask 31744   ;;  %vm238_vm2 = vcmask 64512   ;;  %vm241_vm3 = vcmask 97280   ;;  %vm244_vm4 = vcmask 130048   ;;  %v250_v29 = vld [vmem:[%s794_s2] sm:$0x7] }
  0x16   : > { %s497_s27 = smul.u32 24, %s179_s26  ;;  %vm252_vm5 = vcmask 162816   ;;  %v251_v30 = vperm.slane %v250_v29, 0  ;;  %s175_s26 = sand.u32 1, %s624_s13  }
  0x17   : > { %277 = vmatpush.msra.mxu0 %v248_v9  ;;  %495 = vmatpush.msra.mxu1 %v248_v9  ;;  %s374_s8 = scalar_lea.sflag [#allocation3], %s175_s26 }
  0x18   : > { %s726_s30 = scalar_lea.vmem %s792_s0, %s497_s27  ;;  %s477_s27 = sshll.u32 %s175_s26, 3 }
  0x19   : > { %v479_v0 = vld [vmem:[%s726_s30 + $0x1] sm:$0xff]  ;;  %v480_v4 = vld [vmem:[%s726_s30 + $0x9] sm:$0xff]  ;;  %278 = vmatpush.msra.mxu0 %v247_v10  ;;  %496 = vmatpush.msra.mxu1 %v247_v10 }
  0x1a   : > { %v483_v1 = vld [vmem:[%s726_s30 + $0x3] sm:$0xff]  ;;  %205 = vrot.lane.b32.xlu0 %v479_v0, %s642_s4  ;;  %v484_v6 = vld [vmem:[%s726_s30 + $0xb] sm:$0xff]  ;;  %v332_v0 = vperm.slane %v250_v29, 1 }
  0x1b   : > { %221 = vrot.lane.b32.xlu1 %v483_v1, %s643_s5  ;;  %v485_v2 = vld [vmem:[%s726_s30 + $0x4] sm:$0xff]  ;;  %v486_v7 = vld [vmem:[%s726_s30 + $0xc] sm:$0xff] }
  0x1c   : > { %229 = vrot.lane.b32.xlu2 %v485_v2, %s644_s6  ;;  %v481_v3 = vld [vmem:[%s726_s30 + $0x2] sm:$0xff]  ;;  %v482_v5 = vld [vmem:[%s726_s30 + $0xa] sm:$0xff] }
  0x1d   : > { %v185_v14 = vld [vmem:[%s726_s30] sm:$0xff]  ;;  %v186_v19 = vld [vmem:[%s726_s30 + $0x8] sm:$0xff] }
  0x22   : > { %213 = vrot.lane.b32.xlu0 %v481_v3, %s645_s7 }
  0x23   : > { %207 = vrot.lane.b32.xlu1 %v480_v4, %s642_s4  ;;  %v335_v4 = vperm.slane %v250_v29, 2  ;;  %s385_s4 = scalar_lea.hbm %s795_s3, %s491_s28 }
  0x24   : > { %215 = vrot.lane.b32.xlu2 %v482_v5, %s645_s7  ;;  %s389_s7 = sshll.u32 %s385_s4, 4  ;;  %s390_s7 = int_to_ptr.hbm [resolvable:$true] %s389_s7 }
  0x25   : > { %s576_s9 = sshra.s32 %s390_s7, 4  ;;  %s577_s9 = int_to_ptr.hbm [resolvable:$true] %s576_s9 }
  0x26   : > { %s578_s10 = scalar_lea.hbm %s577_s9, 8  ;;  %p583_p1 = scmp.lt.s32.totalorder %s577_s9, %s795_s3 }
  0x27   : > { %p579_p12 = scmp.ne.s32.totalorder %s577_s9, %s578_s10  ;;  %p584_p2 = scmp.lt.s32.totalorder %s582_s18, %s578_s10 }
  0x29   : > { %p580_p13 = pnand %p579_p12, %p706_p4  ;;  %p585_p3 = por %p584_p2, %p583_p1 }
  0x2a   : > { %223 = vrot.lane.b32.xlu0 %v484_v6, %s643_s5  ;;  %s177_s5 = scalar_lea.vmem [#allocation2], %s477_s27 }
  0x2b   : > { %231 = vrot.lane.b32.xlu1 %v486_v7, %s644_s6  ;;  %s387_s6 = sshll.u32 %s177_s5, 4  ;;  %p581_p0 = pneg %p580_p13  ;;  %s388_s6 = int_to_ptr.vmem [resolvable:$true] %s387_s6 }
  0x2d   : > { %p586_p5 = pnand %p585_p3, %p581_p0 }
  0x76   : > { %v230_v13 = vpop.permute.xlu2 %229 }
  0x7e   : > { %v216_v23 = vpop.permute.xlu2 %215 }
  0x8c   : > { %v206_v11 = vpop.permute.xlu0 %205 }
  0x8d   : > { %v222_v12 = vpop.permute.xlu1 %221  ;;  %v236_v15 = vsel %vm235_vm1, %v185_v14, %v206_v11 }
  0x94   : > { %v214_v16 = vpop.permute.xlu0 %213 }
  0x95   : > { %v208_v17 = vpop.permute.xlu1 %207  ;;  %v239_v18 = vsel %vm238_vm2, %v236_v15, %v214_v16 }
  0x96   : > { %v242_v20 = vsel %vm241_vm3, %v239_v18, %v222_v12  ;;  %v237_v22 = vsel %vm235_vm1, %v186_v19, %v208_v17 }
  0x97   : > { %v245_v21 = vsel %vm244_vm4, %v242_v20, %v230_v13  ;;  %v240_v24 = vsel %vm238_vm2, %v237_v22, %v216_v23 }
  0x98   : > { %488 = vmatmul.msk.f32.vlgmr.msra.gmra.mxu0 %vm252_vm5, %v245_v21 }
  0x9c   : > { %v224_v25 = vpop.permute.xlu0 %223 }
  0x9d   : > { %v232_v26 = vpop.permute.xlu1 %231  ;;  %v243_v27 = vsel %vm241_vm3, %v240_v24, %v224_v25 }
  0x9e   : > { %v246_v28 = vsel %vm244_vm4, %v243_v27, %v232_v26 }
  0x9f   : > { %489 = vmatmul.msk.f32.vlgmr.msra.gmra.mxu1 %vm252_vm5, %v246_v28 }
 0x115   : > { %v280_v31 = vpop.f32.mrf.mxu0 }
 0x116   : > { %v281_v32 = vadd.f32 %v280_v31, %v251_v30 }
 0x118   : > { %286 = vadd.xlane.f32.xlu2 %v281_v32 }
 0x11c   : > { %v283_v33 = vpop.f32.mrf.mxu1 }
 0x11d   : > { %v284_v34 = vadd.f32 %v283_v33, %v251_v30 }
 0x11f   : > { %288 = vadd.xlane.f32.xlu0 %v284_v34 }
 0x18b   : > { %v287_v35 = vpop.xlane.xlu2 %286 }
 0x18c   : > { %v290_v36 = vmul.f32 0.125, %v287_v35 }
 0x18e   : > { %v292_v37 = vsub.f32 %v281_v32, %v290_v36  ;;  %v300_v43 = vmul.f32 %v290_v36, %v290_v36 }
 0x190   : > { %v294_v38 = vmul.f32 %v292_v37, %v292_v37  ;;  %v302_v44 = vmul.f32 120.0, %v300_v43 }
 0x192   : > { %v289_v39 = vpop.xlane.xlu0 %288  ;;  %296 = vadd.xlane.f32.xlu1 %v294_v38 }
 0x193   : > { %v291_v40 = vmul.f32 0.125, %v289_v39 }
 0x195   : > { %v293_v41 = vsub.f32 %v284_v34, %v291_v40  ;;  %v301_v47 = vmul.f32 %v291_v40, %v291_v40 }
 0x197   : > { %v295_v42 = vmul.f32 %v293_v41, %v293_v41  ;;  %v303_v50 = vmul.f32 120.0, %v301_v47 }
 0x199   : > { %298 = vadd.xlane.f32.xlu2 %v295_v42 }
 0x205   : > { %v297_v45 = vpop.xlane.xlu1 %296 }
 0x206   : > { %v304_v46 = vsub.f32 %v297_v45, %v302_v44 }
 0x208   : > { %v306_v48 = vmul.f32 0.125, %v304_v46 }
 0x20a   : > { %v308_v49 = vadd.f32 1e-05, %v306_v48 }
 0x20c   : > { %558 = vrsqrt.f32 %v308_v49  ;;  %v299_v51 = vpop.xlane.xlu2 %298  ;;  %vm316_vm7 = vweird.f32 %v308_v49 }
 0x20d   : > { %v305_v52 = vsub.f32 %v299_v51, %v303_v50 }
 0x20f   : > { %v307_v53 = vmul.f32 0.125, %v305_v52 }
 0x211   : > { %v309_v54 = vadd.f32 1e-05, %v307_v53 }
 0x212   : > { %v559_v55 = vpop.eup %558 }
 0x213   : > { %v311_v56 = vmul.f32 %v559_v55, %v308_v49  ;;  %560 = vrsqrt.f32 %v309_v54  ;;  %vm317_vm6 = vweird.f32 %v559_v55  ;;  %vm326_vm10 = vweird.f32 %v309_v54 }
 0x214   : > { %vm318_vm8 = vmor %vm316_vm7, %vm317_vm6 }
 0x215   : > { %v312_v57 = vmul.f32 %v559_v55, %v311_v56 }
 0x217   : > { %v313_v58 = vmul.f32 0.5, %v312_v57 }
 0x219   : > { %v561_v59 = vpop.eup %560  ;;  %v314_v60 = vsub.f32 1.5, %v313_v58 }
 0x21a   : > { %v321_v61 = vmul.f32 %v561_v59, %v309_v54  ;;  %vm327_vm9 = vweird.f32 %v561_v59 }
 0x21b   : > { %v315_v62 = vmul.f32 %v559_v55, %v314_v60  ;;  %vm328_vm11 = vmor %vm326_vm10, %vm327_vm9 }
 0x21c   : > { %v322_v63 = vmul.f32 %v561_v59, %v321_v61 }
 0x21d   : > { %v319_v1 = vsel %vm318_vm8, %v559_v55, %v315_v62 }
 0x21e   : > { %v323_v2 = vmul.f32 0.5, %v322_v63  ;;  %v330_v3 = vmul.f32 %v319_v1, %v292_v37 }
 0x220   : > { %v324_v5 = vsub.f32 1.5, %v323_v2  ;;  %v333_v6 = vmul.f32 %v332_v0, %v330_v3 }
 0x222   : > { %v325_v7 = vmul.f32 %v561_v59, %v324_v5  ;;  %v336_v8 = vadd.f32 %v335_v4, %v333_v6 }
 0x224   : > { %v329_v9 = vsel %vm328_vm11, %v561_v59, %v325_v7  ;;  %v338_v10 = vmax.f32 %v336_v8, 0.0 }
 0x225   : > { %v331_v11 = vmul.f32 %v329_v9, %v293_v41 }
 0x226   : > { %340 = vxpose.xlu2.b32.start [1/2] (short) (narrow) %v338_v10, 8 }
 0x227   : > { %v334_v12 = vmul.f32 %v332_v0, %v331_v11 }
 0x229   : > { %v337_v13 = vadd.f32 %v335_v4, %v334_v12 }
 0x22b   : > { %v339_v14 = vmax.f32 %v337_v13, 0.0 }
 0x22e   : > { %341 = vxpose.xlu2.b32.end [2/2] (short) (narrow) %v339_v14, 8 }
 0x2bf   : > { %v356_v15 = vpop.trf.xlu2 }
 0x2c0   : > { %372 = vst.msk [vmem:[%s177_s5] sm:$0xff] %vm244_vm4, %v356_v15 }
 0x2c1   : > { %589 = shalt.err (!%p586_p5)
}
 0x2c2   : > { %498 = dma.vmem_to_hbm [thread:$0]  (%p706_p4), %s388_s6, 128, %s390_s7, %s374_s8  }
 0x2c3 PF: > { %p504_p6 = scmp.ge.s32.totalorder %s640_s17, 2  ;;  %s401_s23 = sand.u32 1, %s620_s12  }
 0x2c4   : > { %s402_s26 = scalar_lea.sflag [#allocation3], %s401_s23 }
 0x2c5   : > { %p501_p7 = pnand %p504_p6, %p713_p8 }
 0x2c7   : > { %p502_p9 = pneg %p501_p7 }
 0x2c9   : > { %615 = dma.done.wait (%p502_p9), %s402_s26, 128  }
 0x2ca   : > { %617 = vsyncadd (%p502_p9), %s402_s26, 4294967168  ;;  %s16_s17 = sadd.s32 1, %s640_s17   ;;  %s798_s12 = smov %s624_s13 }
 0x2cb   : > { %p13_p10 = scmp.ge.s32.totalorder %s16_s17, 4   ;;  %s799_s13 = smov %s628_s14 }
 0x2cc   : > { %s800_s14 = smov %s719_s25  ;;  %s801_s15 = smov %s636_s16 }
 0x2cd   : > { %s802_s16 = smov %s804_s20  ;;  %15 = sbr.rel (!%p13_p10) target bundleno = 4 (0x4), region = 72 }
 0x2d2   :  { %408 = vsyncpa [#allocation3], 1 }
 0x2d3   :  { %410 = vsyncpa [#allocation3 + $0x1], 1 }

</bundles_post_ra>
